<compile_context>
chip_gen: v7x
topology: tpu7x:2x2x1
jax: 0.10.0
libtpu: 0.0.40
codegen_flags: <defaults>
</compile_context>

<pallas_src>
import functools

import jax
import jax.numpy as jnp
import numpy as np
from jax.experimental import pallas as pl
from jax.experimental.pallas import tpu as pltpu


def _round_up(n, m):
    return ((n + m - 1) // m) * m


def _pick_time_block(T, max_tt=16):
    """Largest divisor of T not exceeding max_tt (keeps the grid exact)."""
    for tt in range(min(T, max_tt), 0, -1):
        if T % tt == 0:
            return tt
    return 1


def _rnn_seq_kernel(xproj_ref, h0_ref, wh_ref, b_ref,
                    out_ref, hout_ref, h_scratch,
                    *, tt, hidden_pad):
    """One grid step = TT RNN timesteps. Hidden carried in a bf16 VMEM scratch.

    Per inner step:  acc = xproj_t + h @ Wh + b,  acc = [h_new | logits].
    The padded-logit mask is already baked into b (-1e30 lanes).
    """
    tb = pl.program_id(0)

    @pl.when(tb == 0)
    def _():
        h_scratch[...] = h0_ref[...]

    h = h_scratch[...]                                   # (Bp, Hp) bf16 carry
    h_f32 = None
    for i in range(tt):                                  # static -> fully unrolled
        acc = xproj_ref[i] + jnp.dot(h, wh_ref[...],
                                     preferred_element_type=jnp.float32)
        acc = acc + b_ref[...]                           # f32 (Bp, Np)

        h_f32 = acc[:, :hidden_pad]                      # (Bp, Hp), lane-aligned slice
        logits = acc[:, hidden_pad:]                     # (Bp, Op), padded lanes = -1e30

        m = jnp.max(logits, axis=-1, keepdims=True)
        shifted = logits - m
        lse = jnp.log(jnp.sum(jnp.exp(shifted), axis=-1, keepdims=True))
        out_ref[i] = (shifted - lse).astype(out_ref.dtype)

        h = h_f32.astype(jnp.bfloat16)                   # single cast, off the matmul chain

    h_scratch[...] = h

    @pl.when(tb == pl.num_programs(0) - 1)
    def _():
        hout_ref[...] = h_f32                            # f32 final hidden, written once


def prepare_params(w_i2h, b_i2h, w_i2o, b_i2o,
                   input_size, hidden_size, output_size):
    """One-time weight prep (hoisted out of the per-call path).

    PyTorch layout in:  w_i2h (H, I+H), w_i2o (O, I+H).
    Produces fused, pre-transposed, lane-padded weights:
      wx (I, Hp+Op) bf16   -- used by the hoisted XLA projection
      wh (Hp, Hp+Op) bf16  -- used inside the recurrence kernel
      b  (1, Hp+Op) f32    -- fused bias with -1e30 baked into padded logit lanes
    """
    I, H, O = input_size, hidden_size, output_size
    Hp = _round_up(H, 128)
    Op = _round_up(O, 128)
    Np = Hp + Op

    wx_h = w_i2h[:, :I].T.astype(jnp.float32)   # (I, H)
    wh_h = w_i2h[:, I:].T.astype(jnp.float32)   # (H, H)
    wx_o = w_i2o[:, :I].T.astype(jnp.float32)   # (I, O)
    wh_o = w_i2o[:, I:].T.astype(jnp.float32)   # (H, O)

    wx = jnp.zeros((I, Np), jnp.float32)
    wx = wx.at[:, :H].set(wx_h)
    wx = wx.at[:, Hp:Hp + O].set(wx_o)

    wh = jnp.zeros((Hp, Np), jnp.float32)
    wh = wh.at[:H, :H].set(wh_h)
    wh = wh.at[:H, Hp:Hp + O].set(wh_o)

    b = jnp.zeros((1, Np), jnp.float32)
    b = b.at[0, :H].set(b_i2h.astype(jnp.float32))
    b = b.at[0, Hp:Hp + O].set(b_i2o.astype(jnp.float32))
    # Padded weight columns are zero, so padded logits == bias exactly:
    # bake the log-softmax mask into the bias (free per-step masking).
    b = b.at[0, Hp + O:].set(-1e30)

    return dict(wx=wx.astype(jnp.bfloat16), wh=wh.astype(jnp.bfloat16), b=b,
                input_size=I, hidden_size=H, output_size=O, Hp=Hp, Op=Op)


def rnn_forward_seq(xs, h0, params, max_time_block=16):
    """Run the RNN cell over a whole sequence inside one pallas_call.

    xs: (T, B, input_size), h0: (B, hidden_size)
    Returns (log_probs (T, B, output_size), final_hidden (B, hidden_size)).
    """
    T, B, I = xs.shape
    H = params["hidden_size"]
    O = params["output_size"]
    Hp, Op = params["Hp"], params["Op"]
    Np = Hp + Op
    Bp = _round_up(B, 8)
    TT = _pick_time_block(T, max_time_block)

    # Pad batch on the (small) input, then hoist the time-parallel projection:
    # one big MXU pass with T*Bp rows of occupancy instead of Bp rows per step.
    xs_p = jnp.zeros((T, Bp, I), jnp.bfloat16).at[:, :B, :].set(
        xs.astype(jnp.bfloat16))
    xproj = jnp.einsum("tbi,in->tbn", xs_p, params["wx"],
                       preferred_element_type=jnp.float32)      # (T, Bp, Np) f32

    h0_p = jnp.zeros((Bp, Hp), jnp.bfloat16).at[:B, :H].set(
        h0.astype(jnp.bfloat16))

    kernel = functools.partial(_rnn_seq_kernel, tt=TT, hidden_pad=Hp)

    out_p, h_p = pl.pallas_call(
        kernel,
        out_shape=(
            jax.ShapeDtypeStruct((T, Bp, Op), jnp.float32),
            jax.ShapeDtypeStruct((Bp, Hp), jnp.float32),
        ),
        grid=(T // TT,),
        in_specs=[
            pl.BlockSpec((TT, Bp, Np), lambda t: (t, 0, 0)),   # xproj time block
            pl.BlockSpec((Bp, Hp), lambda t: (0, 0)),          # h0 (VMEM-resident)
            pl.BlockSpec((Hp, Np), lambda t: (0, 0)),          # Wh fused (resident)
            pl.BlockSpec((1, Np), lambda t: (0, 0)),           # fused bias + logit mask
        ],
        out_specs=(
            pl.BlockSpec((TT, Bp, Op), lambda t: (t, 0, 0)),   # per-step log-probs
            pl.BlockSpec((Bp, Hp), lambda t: (0, 0)),          # final hidden
        ),
        scratch_shapes=[pltpu.VMEM((Bp, Hp), jnp.bfloat16)],   # hidden carry (bf16)
        compiler_params=pltpu.CompilerParams(
            dimension_semantics=("arbitrary",)),               # time is serial
    )(xproj, h0_p, params["wh"], params["b"])

    # TODO(synk): for large batch on v7x, add a leading "parallel" batch-tile
    # grid axis (one hidden-carry slot per tile) to use the second TensorCore.
    return out_p[:, :B, :O], h_p[:B, :H]


def rnn_forward(x, h, params):
    """Single-step forward matching the PyTorch module's forward(input, hidden)."""
    out, h_new = rnn_forward_seq(x[None], h, params)
    return out[0], h_new


def init_params(key, input_size, hidden_size, output_size):
    """Deterministic init mimicking nn.Linear's U(-1/sqrt(fan_in), 1/sqrt(fan_in))."""
    fan_in = input_size + hidden_size
    bound = 1.0 / np.sqrt(fan_in)
    k1, k2, k3, k4 = jax.random.split(key, 4)
    w_i2h = jax.random.uniform(k1, (hidden_size, fan_in), jnp.float32, -bound, bound)
    b_i2h = jax.random.uniform(k2, (hidden_size,), jnp.float32, -bound, bound)
    w_i2o = jax.random.uniform(k3, (output_size, fan_in), jnp.float32, -bound, bound)
    b_i2o = jax.random.uniform(k4, (output_size,), jnp.float32, -bound, bound)
    return w_i2h, b_i2h, w_i2o, b_i2o


if __name__ == "__main__":
    input_size, hidden_size, output_size = 16, 32, 24
    batch, seq_len = 2, 8

    key = jax.random.PRNGKey(0)
    kx, kp = jax.random.split(key)
    xs = jax.random.normal(kx, (seq_len, batch, input_size), jnp.float32)
    h0 = jnp.zeros((batch, hidden_size), jnp.float32)   # initHidden() analogue

    w_i2h, b_i2h, w_i2o, b_i2o = init_params(kp, input_size, hidden_size, output_size)
    params = prepare_params(w_i2h, b_i2h, w_i2o, b_i2o,
                            input_size, hidden_size, output_size)

    # Full sequence: hoisted x-projection + single pallas_call recurrence.
    out_seq, h_final = rnn_forward_seq(xs, h0, params)
    # Single-step API (same semantics as the PyTorch forward).
    out_0, h_1 = rnn_forward(xs[0], h0, params)
    jax.block_until_ready((out_seq, h_final, out_0, h_1))

    # Pure-JAX f32 reference, step by step (matches the PyTorch module).
    def ref_step(h, x):
        comb = jnp.concatenate([x, h], axis=1)
        h_new = comb @ w_i2h.T + b_i2h
        logits = comb @ w_i2o.T + b_i2o
        return h_new, jax.nn.log_softmax(logits, axis=1)

    h_ref = h0
    outs_ref = []
    for t in range(seq_len):
        h_ref, o_ref = ref_step(h_ref, xs[t])
        outs_ref.append(o_ref)
    outs_ref = jnp.stack(outs_ref)

    # bf16 MXU operands => tolerances loosened vs. the pure-f32 reference.
    np.testing.assert_allclose(np.asarray(out_seq), np.asarray(outs_ref),
                               rtol=5e-2, atol=5e-2)
    np.testing.assert_allclose(np.asarray(h_final), np.asarray(h_ref),
                               rtol=5e-2, atol=5e-2)
    np.testing.assert_allclose(np.asarray(out_0), np.asarray(outs_ref[0]),
                               rtol=5e-2, atol=5e-2)

    print("KERNEL_OK")
</pallas_src>

<mosaic_0001>
module attributes {stable_mosaic.version = 11 : i64} {
  func.func @_rnn_seq_kernel(%arg0: i32, %arg1: memref<8x8x256xf32, #tpu.memory_space<vmem>>, %arg2: memref<8x128xbf16, #tpu.memory_space<vmem>>, %arg3: memref<128x256xbf16, #tpu.memory_space<vmem>>, %arg4: memref<1x256xf32, #tpu.memory_space<vmem>>, %arg5: memref<8x8x128xf32, #tpu.memory_space<vmem>>, %arg6: memref<8x128xf32, #tpu.memory_space<vmem>>, %arg7: memref<8x128xbf16, #tpu.memory_space<vmem>>) attributes {dimension_semantics = [#tpu.dimension_semantics<arbitrary>], iteration_bounds = array<i64: 1>, scalar_prefetch = 0 : i64, scratch_operands = 1 : i64, tpu.core_type = #tpu.core_type<tc>, window_params = [{transform_indices = @transform_0, window_bounds = array<i64: 8, 8, 256>}, {pipeline_mode = #tpu.pipeline_mode<synchronous>, transform_indices = @transform_1, window_bounds = array<i64: 8, 128>}, {pipeline_mode = #tpu.pipeline_mode<synchronous>, transform_indices = @transform_2, window_bounds = array<i64: 128, 256>}, {pipeline_mode = #tpu.pipeline_mode<synchronous>, transform_indices = @transform_3, window_bounds = array<i64: 1, 256>}, {transform_indices = @transform_4, window_bounds = array<i64: 8, 8, 128>}, {pipeline_mode = #tpu.pipeline_mode<synchronous>, transform_indices = @transform_5, window_bounds = array<i64: 8, 128>}]} {
    %c0_i32 = arith.constant 0 : i32
    %0 = arith.cmpi eq, %arg0, %c0_i32 : i32
    %1 = arith.extui %0 : i1 to i32
    %c0_i32_0 = arith.constant 0 : i32
    %2 = arith.cmpi ne, %1, %c0_i32_0 : i32
    scf.if %2 {
      %c0_102 = arith.constant 0 : index
      %c0_103 = arith.constant 0 : index
      %200 = vector.load %arg2[%c0_102, %c0_103] : memref<8x128xbf16, #tpu.memory_space<vmem>>, vector<8x128xbf16>
      %c0_104 = arith.constant 0 : index
      %c0_105 = arith.constant 0 : index
      %201 = vector.load %arg7[%c0_104, %c0_105] : memref<8x128xbf16, #tpu.memory_space<vmem>>, vector<8x128xbf16>
      tpu.vector_store %arg7[%c0_104, %c0_105], %200 {strides = array<i32>} : memref<8x128xbf16, #tpu.memory_space<vmem>>, vector<8x128xbf16>,
    } else {
    }
    %c0 = arith.constant 0 : index
    %c0_1 = arith.constant 0 : index
    %3 = vector.load %arg7[%c0, %c0_1] : memref<8x128xbf16, #tpu.memory_space<vmem>>, vector<8x128xbf16>
    %c0_2 = arith.constant 0 : index
    %c0_3 = arith.constant 0 : index
    %c0_4 = arith.constant 0 : index
    %4 = vector.load %arg1[%c0_2, %c0_3, %c0_4] : memref<8x8x256xf32, #tpu.memory_space<vmem>>, vector<1x8x256xf32>
    %5 = vector.shape_cast %4 : vector<1x8x256xf32> to vector<8x256xf32>
    %c0_5 = arith.constant 0 : index
    %c0_6 = arith.constant 0 : index
    %6 = vector.load %arg3[%c0_5, %c0_6] : memref<128x256xbf16, #tpu.memory_space<vmem>>, vector<128x256xbf16>
    %cst = arith.constant dense<0.000000e+00> : vector<8x256xf32>
    %7 = tpu.matmul %3, %6, %cst {dimension_numbers = #tpu.dot_dimension_numbers<[1], [0], [0], [1], [0, 0, 1, 1], [], []>} : vector<8x128xbf16>, vector<128x256xbf16>, vector<8x256xf32> -> vector<8x256xf32>
    %8 = arith.addf %5, %7 : vector<8x256xf32>
    %c0_7 = arith.constant 0 : index
    %c0_8 = arith.constant 0 : index
    %9 = vector.load %arg4[%c0_7, %c0_8] : memref<1x256xf32, #tpu.memory_space<vmem>>, vector<1x256xf32>
    %10 = vector.broadcast %9 : vector<1x256xf32> to vector<8x256xf32>
    %11 = arith.addf %8, %10 : vector<8x256xf32>
    %12 = vector.extract_strided_slice %11 {offsets = [0, 0], sizes = [8, 128], strides = [1, 1]} : vector<8x256xf32> to vector<8x128xf32>
    %13 = vector.extract_strided_slice %11 {offsets = [0, 128], sizes = [8, 128], strides = [1, 1]} : vector<8x256xf32> to vector<8x128xf32>
    %cst_9 = arith.constant dense<0xFF800000> : vector<8xf32>
    %14 = vector.multi_reduction <maximumf>, %13, %cst_9 [1] : vector<8x128xf32> to vector<8xf32>
    %15 = vector.shape_cast %14 : vector<8xf32> to vector<8x1xf32>
    %16 = vector.broadcast %15 : vector<8x1xf32> to vector<8x128xf32>
    %17 = arith.subf %13, %16 : vector<8x128xf32>
    %18 = math.exp %17 : vector<8x128xf32>
    %cst_10 = arith.constant dense<0.000000e+00> : vector<8xf32>
    %19 = vector.multi_reduction <add>, %18, %cst_10 [1] : vector<8x128xf32> to vector<8xf32>
    %20 = vector.shape_cast %19 : vector<8xf32> to vector<8x1xf32>
    %21 = math.log %20 : vector<8x1xf32>
    %22 = vector.broadcast %21 : vector<8x1xf32> to vector<8x128xf32>
    %23 = arith.subf %17, %22 : vector<8x128xf32>
    %c0_11 = arith.constant 0 : index
    %c0_12 = arith.constant 0 : index
    %c0_13 = arith.constant 0 : index
    %24 = vector.load %arg5[%c0_11, %c0_12, %c0_13] : memref<8x8x128xf32, #tpu.memory_space<vmem>>, vector<1x8x128xf32>
    %25 = vector.shape_cast %24 : vector<1x8x128xf32> to vector<8x128xf32>
    %26 = vector.shape_cast %23 : vector<8x128xf32> to vector<1x8x128xf32>
    tpu.vector_store %arg5[%c0_11, %c0_12, %c0_13], %26 {strides = array<i32>} : memref<8x8x128xf32, #tpu.memory_space<vmem>>, vector<1x8x128xf32>,
    %27 = arith.truncf %12 : vector<8x128xf32> to vector<8x128xbf16>
    %c1 = arith.constant 1 : index
    %c0_14 = arith.constant 0 : index
    %c0_15 = arith.constant 0 : index
    %28 = vector.load %arg1[%c1, %c0_14, %c0_15] : memref<8x8x256xf32, #tpu.memory_space<vmem>>, vector<1x8x256xf32>
    %29 = vector.shape_cast %28 : vector<1x8x256xf32> to vector<8x256xf32>
    %c0_16 = arith.constant 0 : index
    %c0_17 = arith.constant 0 : index
    %30 = vector.load %arg3[%c0_16, %c0_17] : memref<128x256xbf16, #tpu.memory_space<vmem>>, vector<128x256xbf16>
    %cst_18 = arith.constant dense<0.000000e+00> : vector<8x256xf32>
    %31 = tpu.matmul %27, %30, %cst_18 {dimension_numbers = #tpu.dot_dimension_numbers<[1], [0], [0], [1], [0, 0, 1, 1], [], []>} : vector<8x128xbf16>, vector<128x256xbf16>, vector<8x256xf32> -> vector<8x256xf32>
    %32 = arith.addf %29, %31 : vector<8x256xf32>
    %c0_19 = arith.constant 0 : index
    %c0_20 = arith.constant 0 : index
    %33 = vector.load %arg4[%c0_19, %c0_20] : memref<1x256xf32, #tpu.memory_space<vmem>>, vector<1x256xf32>
    %34 = vector.broadcast %33 : vector<1x256xf32> to vector<8x256xf32>
    %35 = arith.addf %32, %34 : vector<8x256xf32>
    %36 = vector.extract_strided_slice %35 {offsets = [0, 0], sizes = [8, 128], strides = [1, 1]} : vector<8x256xf32> to vector<8x128xf32>
    %37 = vector.extract_strided_slice %35 {offsets = [0, 128], sizes = [8, 128], strides = [1, 1]} : vector<8x256xf32> to vector<8x128xf32>
    %cst_21 = arith.constant dense<0xFF800000> : vector<8xf32>
    %38 = vector.multi_reduction <maximumf>, %37, %cst_21 [1] : vector<8x128xf32> to vector<8xf32>
    %39 = vector.shape_cast %38 : vector<8xf32> to vector<8x1xf32>
    %40 = vector.broadcast %39 : vector<8x1xf32> to vector<8x128xf32>
    %41 = arith.subf %37, %40 : vector<8x128xf32>
    %42 = math.exp %41 : vector<8x128xf32>
    %cst_22 = arith.constant dense<0.000000e+00> : vector<8xf32>
    %43 = vector.multi_reduction <add>, %42, %cst_22 [1] : vector<8x128xf32> to vector<8xf32>
    %44 = vector.shape_cast %43 : vector<8xf32> to vector<8x1xf32>
    %45 = math.log %44 : vector<8x1xf32>
    %46 = vector.broadcast %45 : vector<8x1xf32> to vector<8x128xf32>
    %47 = arith.subf %41, %46 : vector<8x128xf32>
    %c1_23 = arith.constant 1 : index
    %c0_24 = arith.constant 0 : index
    %c0_25 = arith.constant 0 : index
    %48 = vector.load %arg5[%c1_23, %c0_24, %c0_25] : memref<8x8x128xf32, #tpu.memory_space<vmem>>, vector<1x8x128xf32>
    %49 = vector.shape_cast %48 : vector<1x8x128xf32> to vector<8x128xf32>
    %50 = vector.shape_cast %47 : vector<8x128xf32> to vector<1x8x128xf32>
    tpu.vector_store %arg5[%c1_23, %c0_24, %c0_25], %50 {strides = array<i32>} : memref<8x8x128xf32, #tpu.memory_space<vmem>>, vector<1x8x128xf32>,
    %51 = arith.truncf %36 : vector<8x128xf32> to vector<8x128xbf16>
    %c2 = arith.constant 2 : index
    %c0_26 = arith.constant 0 : index
    %c0_27 = arith.constant 0 : index
    %52 = vector.load %arg1[%c2, %c0_26, %c0_27] : memref<8x8x256xf32, #tpu.memory_space<vmem>>, vector<1x8x256xf32>
    %53 = vector.shape_cast %52 : vector<1x8x256xf32> to vector<8x256xf32>
    %c0_28 = arith.constant 0 : index
    %c0_29 = arith.constant 0 : index
    %54 = vector.load %arg3[%c0_28, %c0_29] : memref<128x256xbf16, #tpu.memory_space<vmem>>, vector<128x256xbf16>
    %cst_30 = arith.constant dense<0.000000e+00> : vector<8x256xf32>
    %55 = tpu.matmul %51, %54, %cst_30 {dimension_numbers = #tpu.dot_dimension_numbers<[1], [0], [0], [1], [0, 0, 1, 1], [], []>} : vector<8x128xbf16>, vector<128x256xbf16>, vector<8x256xf32> -> vector<8x256xf32>
    %56 = arith.addf %53, %55 : vector<8x256xf32>
    %c0_31 = arith.constant 0 : index
    %c0_32 = arith.constant 0 : index
    %57 = vector.load %arg4[%c0_31, %c0_32] : memref<1x256xf32, #tpu.memory_space<vmem>>, vector<1x256xf32>
    %58 = vector.broadcast %57 : vector<1x256xf32> to vector<8x256xf32>
    %59 = arith.addf %56, %58 : vector<8x256xf32>
    %60 = vector.extract_strided_slice %59 {offsets = [0, 0], sizes = [8, 128], strides = [1, 1]} : vector<8x256xf32> to vector<8x128xf32>
    %61 = vector.extract_strided_slice %59 {offsets = [0, 128], sizes = [8, 128], strides = [1, 1]} : vector<8x256xf32> to vector<8x128xf32>
    %cst_33 = arith.constant dense<0xFF800000> : vector<8xf32>
    %62 = vector.multi_reduction <maximumf>, %61, %cst_33 [1] : vector<8x128xf32> to vector<8xf32>
    %63 = vector.shape_cast %62 : vector<8xf32> to vector<8x1xf32>
    %64 = vector.broadcast %63 : vector<8x1xf32> to vector<8x128xf32>
    %65 = arith.subf %61, %64 : vector<8x128xf32>
    %66 = math.exp %65 : vector<8x128xf32>
    %cst_34 = arith.constant dense<0.000000e+00> : vector<8xf32>
    %67 = vector.multi_reduction <add>, %66, %cst_34 [1] : vector<8x128xf32> to vector<8xf32>
    %68 = vector.shape_cast %67 : vector<8xf32> to vector<8x1xf32>
    %69 = math.log %68 : vector<8x1xf32>
    %70 = vector.broadcast %69 : vector<8x1xf32> to vector<8x128xf32>
    %71 = arith.subf %65, %70 : vector<8x128xf32>
    %c2_35 = arith.constant 2 : index
    %c0_36 = arith.constant 0 : index
    %c0_37 = arith.constant 0 : index
    %72 = vector.load %arg5[%c2_35, %c0_36, %c0_37] : memref<8x8x128xf32, #tpu.memory_space<vmem>>, vector<1x8x128xf32>
    %73 = vector.shape_cast %72 : vector<1x8x128xf32> to vector<8x128xf32>
    %74 = vector.shape_cast %71 : vector<8x128xf32> to vector<1x8x128xf32>
    tpu.vector_store %arg5[%c2_35, %c0_36, %c0_37], %74 {strides = array<i32>} : memref<8x8x128xf32, #tpu.memory_space<vmem>>, vector<1x8x128xf32>,
    %75 = arith.truncf %60 : vector<8x128xf32> to vector<8x128xbf16>
    %c3 = arith.constant 3 : index
    %c0_38 = arith.constant 0 : index
    %c0_39 = arith.constant 0 : index
    %76 = vector.load %arg1[%c3, %c0_38, %c0_39] : memref<8x8x256xf32, #tpu.memory_space<vmem>>, vector<1x8x256xf32>
    %77 = vector.shape_cast %76 : vector<1x8x256xf32> to vector<8x256xf32>
    %c0_40 = arith.constant 0 : index
    %c0_41 = arith.constant 0 : index
    %78 = vector.load %arg3[%c0_40, %c0_41] : memref<128x256xbf16, #tpu.memory_space<vmem>>, vector<128x256xbf16>
    %cst_42 = arith.constant dense<0.000000e+00> : vector<8x256xf32>
    %79 = tpu.matmul %75, %78, %cst_42 {dimension_numbers = #tpu.dot_dimension_numbers<[1], [0], [0], [1], [0, 0, 1, 1], [], []>} : vector<8x128xbf16>, vector<128x256xbf16>, vector<8x256xf32> -> vector<8x256xf32>
    %80 = arith.addf %77, %79 : vector<8x256xf32>
    %c0_43 = arith.constant 0 : index
    %c0_44 = arith.constant 0 : index
    %81 = vector.load %arg4[%c0_43, %c0_44] : memref<1x256xf32, #tpu.memory_space<vmem>>, vector<1x256xf32>
    %82 = vector.broadcast %81 : vector<1x256xf32> to vector<8x256xf32>
    %83 = arith.addf %80, %82 : vector<8x256xf32>
    %84 = vector.extract_strided_slice %83 {offsets = [0, 0], sizes = [8, 128], strides = [1, 1]} : vector<8x256xf32> to vector<8x128xf32>
    %85 = vector.extract_strided_slice %83 {offsets = [0, 128], sizes = [8, 128], strides = [1, 1]} : vector<8x256xf32> to vector<8x128xf32>
    %cst_45 = arith.constant dense<0xFF800000> : vector<8xf32>
    %86 = vector.multi_reduction <maximumf>, %85, %cst_45 [1] : vector<8x128xf32> to vector<8xf32>
    %87 = vector.shape_cast %86 : vector<8xf32> to vector<8x1xf32>
    %88 = vector.broadcast %87 : vector<8x1xf32> to vector<8x128xf32>
    %89 = arith.subf %85, %88 : vector<8x128xf32>
    %90 = math.exp %89 : vector<8x128xf32>
    %cst_46 = arith.constant dense<0.000000e+00> : vector<8xf32>
    %91 = vector.multi_reduction <add>, %90, %cst_46 [1] : vector<8x128xf32> to vector<8xf32>
    %92 = vector.shape_cast %91 : vector<8xf32> to vector<8x1xf32>
    %93 = math.log %92 : vector<8x1xf32>
    %94 = vector.broadcast %93 : vector<8x1xf32> to vector<8x128xf32>
    %95 = arith.subf %89, %94 : vector<8x128xf32>
    %c3_47 = arith.constant 3 : index
    %c0_48 = arith.constant 0 : index
    %c0_49 = arith.constant 0 : index
    %96 = vector.load %arg5[%c3_47, %c0_48, %c0_49] : memref<8x8x128xf32, #tpu.memory_space<vmem>>, vector<1x8x128xf32>
    %97 = vector.shape_cast %96 : vector<1x8x128xf32> to vector<8x128xf32>
    %98 = vector.shape_cast %95 : vector<8x128xf32> to vector<1x8x128xf32>
    tpu.vector_store %arg5[%c3_47, %c0_48, %c0_49], %98 {strides = array<i32>} : memref<8x8x128xf32, #tpu.memory_space<vmem>>, vector<1x8x128xf32>,
    %99 = arith.truncf %84 : vector<8x128xf32> to vector<8x128xbf16>
    %c4 = arith.constant 4 : index
    %c0_50 = arith.constant 0 : index
    %c0_51 = arith.constant 0 : index
    %100 = vector.load %arg1[%c4, %c0_50, %c0_51] : memref<8x8x256xf32, #tpu.memory_space<vmem>>, vector<1x8x256xf32>
    %101 = vector.shape_cast %100 : vector<1x8x256xf32> to vector<8x256xf32>
    %c0_52 = arith.constant 0 : index
    %c0_53 = arith.constant 0 : index
    %102 = vector.load %arg3[%c0_52, %c0_53] : memref<128x256xbf16, #tpu.memory_space<vmem>>, vector<128x256xbf16>
    %cst_54 = arith.constant dense<0.000000e+00> : vector<8x256xf32>
    %103 = tpu.matmul %99, %102, %cst_54 {dimension_numbers = #tpu.dot_dimension_numbers<[1], [0], [0], [1], [0, 0, 1, 1], [], []>} : vector<8x128xbf16>, vector<128x256xbf16>, vector<8x256xf32> -> vector<8x256xf32>
    %104 = arith.addf %101, %103 : vector<8x256xf32>
    %c0_55 = arith.constant 0 : index
    %c0_56 = arith.constant 0 : index
    %105 = vector.load %arg4[%c0_55, %c0_56] : memref<1x256xf32, #tpu.memory_space<vmem>>, vector<1x256xf32>
    %106 = vector.broadcast %105 : vector<1x256xf32> to vector<8x256xf32>
    %107 = arith.addf %104, %106 : vector<8x256xf32>
    %108 = vector.extract_strided_slice %107 {offsets = [0, 0], sizes = [8, 128], strides = [1, 1]} : vector<8x256xf32> to vector<8x128xf32>
    %109 = vector.extract_strided_slice %107 {offsets = [0, 128], sizes = [8, 128], strides = [1, 1]} : vector<8x256xf32> to vector<8x128xf32>
    %cst_57 = arith.constant dense<0xFF800000> : vector<8xf32>
    %110 = vector.multi_reduction <maximumf>, %109, %cst_57 [1] : vector<8x128xf32> to vector<8xf32>
    %111 = vector.shape_cast %110 : vector<8xf32> to vector<8x1xf32>
    %112 = vector.broadcast %111 : vector<8x1xf32> to vector<8x128xf32>
    %113 = arith.subf %109, %112 : vector<8x128xf32>
    %114 = math.exp %113 : vector<8x128xf32>
    %cst_58 = arith.constant dense<0.000000e+00> : vector<8xf32>
    %115 = vector.multi_reduction <add>, %114, %cst_58 [1] : vector<8x128xf32> to vector<8xf32>
    %116 = vector.shape_cast %115 : vector<8xf32> to vector<8x1xf32>
    %117 = math.log %116 : vector<8x1xf32>
    %118 = vector.broadcast %117 : vector<8x1xf32> to vector<8x128xf32>
    %119 = arith.subf %113, %118 : vector<8x128xf32>
    %c4_59 = arith.constant 4 : index
    %c0_60 = arith.constant 0 : index
    %c0_61 = arith.constant 0 : index
    %120 = vector.load %arg5[%c4_59, %c0_60, %c0_61] : memref<8x8x128xf32, #tpu.memory_space<vmem>>, vector<1x8x128xf32>
    %121 = vector.shape_cast %120 : vector<1x8x128xf32> to vector<8x128xf32>
    %122 = vector.shape_cast %119 : vector<8x128xf32> to vector<1x8x128xf32>
    tpu.vector_store %arg5[%c4_59, %c0_60, %c0_61], %122 {strides = array<i32>} : memref<8x8x128xf32, #tpu.memory_space<vmem>>, vector<1x8x128xf32>,
    %123 = arith.truncf %108 : vector<8x128xf32> to vector<8x128xbf16>
    %c5 = arith.constant 5 : index
    %c0_62 = arith.constant 0 : index
    %c0_63 = arith.constant 0 : index
    %124 = vector.load %arg1[%c5, %c0_62, %c0_63] : memref<8x8x256xf32, #tpu.memory_space<vmem>>, vector<1x8x256xf32>
    %125 = vector.shape_cast %124 : vector<1x8x256xf32> to vector<8x256xf32>
    %c0_64 = arith.constant 0 : index
    %c0_65 = arith.constant 0 : index
    %126 = vector.load %arg3[%c0_64, %c0_65] : memref<128x256xbf16, #tpu.memory_space<vmem>>, vector<128x256xbf16>
    %cst_66 = arith.constant dense<0.000000e+00> : vector<8x256xf32>
    %127 = tpu.matmul %123, %126, %cst_66 {dimension_numbers = #tpu.dot_dimension_numbers<[1], [0], [0], [1], [0, 0, 1, 1], [], []>} : vector<8x128xbf16>, vector<128x256xbf16>, vector<8x256xf32> -> vector<8x256xf32>
    %128 = arith.addf %125, %127 : vector<8x256xf32>
    %c0_67 = arith.constant 0 : index
    %c0_68 = arith.constant 0 : index
    %129 = vector.load %arg4[%c0_67, %c0_68] : memref<1x256xf32, #tpu.memory_space<vmem>>, vector<1x256xf32>
    %130 = vector.broadcast %129 : vector<1x256xf32> to vector<8x256xf32>
    %131 = arith.addf %128, %130 : vector<8x256xf32>
    %132 = vector.extract_strided_slice %131 {offsets = [0, 0], sizes = [8, 128], strides = [1, 1]} : vector<8x256xf32> to vector<8x128xf32>
    %133 = vector.extract_strided_slice %131 {offsets = [0, 128], sizes = [8, 128], strides = [1, 1]} : vector<8x256xf32> to vector<8x128xf32>
    %cst_69 = arith.constant dense<0xFF800000> : vector<8xf32>
    %134 = vector.multi_reduction <maximumf>, %133, %cst_69 [1] : vector<8x128xf32> to vector<8xf32>
    %135 = vector.shape_cast %134 : vector<8xf32> to vector<8x1xf32>
    %136 = vector.broadcast %135 : vector<8x1xf32> to vector<8x128xf32>
    %137 = arith.subf %133, %136 : vector<8x128xf32>
    %138 = math.exp %137 : vector<8x128xf32>
    %cst_70 = arith.constant dense<0.000000e+00> : vector<8xf32>
    %139 = vector.multi_reduction <add>, %138, %cst_70 [1] : vector<8x128xf32> to vector<8xf32>
    %140 = vector.shape_cast %139 : vector<8xf32> to vector<8x1xf32>
    %141 = math.log %140 : vector<8x1xf32>
    %142 = vector.broadcast %141 : vector<8x1xf32> to vector<8x128xf32>
    %143 = arith.subf %137, %142 : vector<8x128xf32>
    %c5_71 = arith.constant 5 : index
    %c0_72 = arith.constant 0 : index
    %c0_73 = arith.constant 0 : index
    %144 = vector.load %arg5[%c5_71, %c0_72, %c0_73] : memref<8x8x128xf32, #tpu.memory_space<vmem>>, vector<1x8x128xf32>
    %145 = vector.shape_cast %144 : vector<1x8x128xf32> to vector<8x128xf32>
    %146 = vector.shape_cast %143 : vector<8x128xf32> to vector<1x8x128xf32>
    tpu.vector_store %arg5[%c5_71, %c0_72, %c0_73], %146 {strides = array<i32>} : memref<8x8x128xf32, #tpu.memory_space<vmem>>, vector<1x8x128xf32>,
    %147 = arith.truncf %132 : vector<8x128xf32> to vector<8x128xbf16>
    %c6 = arith.constant 6 : index
    %c0_74 = arith.constant 0 : index
    %c0_75 = arith.constant 0 : index
    %148 = vector.load %arg1[%c6, %c0_74, %c0_75] : memref<8x8x256xf32, #tpu.memory_space<vmem>>, vector<1x8x256xf32>
    %149 = vector.shape_cast %148 : vector<1x8x256xf32> to vector<8x256xf32>
    %c0_76 = arith.constant 0 : index
    %c0_77 = arith.constant 0 : index
    %150 = vector.load %arg3[%c0_76, %c0_77] : memref<128x256xbf16, #tpu.memory_space<vmem>>, vector<128x256xbf16>
    %cst_78 = arith.constant dense<0.000000e+00> : vector<8x256xf32>
    %151 = tpu.matmul %147, %150, %cst_78 {dimension_numbers = #tpu.dot_dimension_numbers<[1], [0], [0], [1], [0, 0, 1, 1], [], []>} : vector<8x128xbf16>, vector<128x256xbf16>, vector<8x256xf32> -> vector<8x256xf32>
    %152 = arith.addf %149, %151 : vector<8x256xf32>
    %c0_79 = arith.constant 0 : index
    %c0_80 = arith.constant 0 : index
    %153 = vector.load %arg4[%c0_79, %c0_80] : memref<1x256xf32, #tpu.memory_space<vmem>>, vector<1x256xf32>
    %154 = vector.broadcast %153 : vector<1x256xf32> to vector<8x256xf32>
    %155 = arith.addf %152, %154 : vector<8x256xf32>
    %156 = vector.extract_strided_slice %155 {offsets = [0, 0], sizes = [8, 128], strides = [1, 1]} : vector<8x256xf32> to vector<8x128xf32>
    %157 = vector.extract_strided_slice %155 {offsets = [0, 128], sizes = [8, 128], strides = [1, 1]} : vector<8x256xf32> to vector<8x128xf32>
    %cst_81 = arith.constant dense<0xFF800000> : vector<8xf32>
    %158 = vector.multi_reduction <maximumf>, %157, %cst_81 [1] : vector<8x128xf32> to vector<8xf32>
    %159 = vector.shape_cast %158 : vector<8xf32> to vector<8x1xf32>
    %160 = vector.broadcast %159 : vector<8x1xf32> to vector<8x128xf32>
    %161 = arith.subf %157, %160 : vector<8x128xf32>
    %162 = math.exp %161 : vector<8x128xf32>
    %cst_82 = arith.constant dense<0.000000e+00> : vector<8xf32>
    %163 = vector.multi_reduction <add>, %162, %cst_82 [1] : vector<8x128xf32> to vector<8xf32>
    %164 = vector.shape_cast %163 : vector<8xf32> to vector<8x1xf32>
    %165 = math.log %164 : vector<8x1xf32>
    %166 = vector.broadcast %165 : vector<8x1xf32> to vector<8x128xf32>
    %167 = arith.subf %161, %166 : vector<8x128xf32>
    %c6_83 = arith.constant 6 : index
    %c0_84 = arith.constant 0 : index
    %c0_85 = arith.constant 0 : index
    %168 = vector.load %arg5[%c6_83, %c0_84, %c0_85] : memref<8x8x128xf32, #tpu.memory_space<vmem>>, vector<1x8x128xf32>
    %169 = vector.shape_cast %168 : vector<1x8x128xf32> to vector<8x128xf32>
    %170 = vector.shape_cast %167 : vector<8x128xf32> to vector<1x8x128xf32>
    tpu.vector_store %arg5[%c6_83, %c0_84, %c0_85], %170 {strides = array<i32>} : memref<8x8x128xf32, #tpu.memory_space<vmem>>, vector<1x8x128xf32>,
    %171 = arith.truncf %156 : vector<8x128xf32> to vector<8x128xbf16>
    %c7 = arith.constant 7 : index
    %c0_86 = arith.constant 0 : index
    %c0_87 = arith.constant 0 : index
    %172 = vector.load %arg1[%c7, %c0_86, %c0_87] : memref<8x8x256xf32, #tpu.memory_space<vmem>>, vector<1x8x256xf32>
    %173 = vector.shape_cast %172 : vector<1x8x256xf32> to vector<8x256xf32>
    %c0_88 = arith.constant 0 : index
    %c0_89 = arith.constant 0 : index
    %174 = vector.load %arg3[%c0_88, %c0_89] : memref<128x256xbf16, #tpu.memory_space<vmem>>, vector<128x256xbf16>
    %cst_90 = arith.constant dense<0.000000e+00> : vector<8x256xf32>
    %175 = tpu.matmul %171, %174, %cst_90 {dimension_numbers = #tpu.dot_dimension_numbers<[1], [0], [0], [1], [0, 0, 1, 1], [], []>} : vector<8x128xbf16>, vector<128x256xbf16>, vector<8x256xf32> -> vector<8x256xf32>
    %176 = arith.addf %173, %175 : vector<8x256xf32>
    %c0_91 = arith.constant 0 : index
    %c0_92 = arith.constant 0 : index
    %177 = vector.load %arg4[%c0_91, %c0_92] : memref<1x256xf32, #tpu.memory_space<vmem>>, vector<1x256xf32>
    %178 = vector.broadcast %177 : vector<1x256xf32> to vector<8x256xf32>
    %179 = arith.addf %176, %178 : vector<8x256xf32>
    %180 = vector.extract_strided_slice %179 {offsets = [0, 0], sizes = [8, 128], strides = [1, 1]} : vector<8x256xf32> to vector<8x128xf32>
    %181 = vector.extract_strided_slice %179 {offsets = [0, 128], sizes = [8, 128], strides = [1, 1]} : vector<8x256xf32> to vector<8x128xf32>
    %cst_93 = arith.constant dense<0xFF800000> : vector<8xf32>
    %182 = vector.multi_reduction <maximumf>, %181, %cst_93 [1] : vector<8x128xf32> to vector<8xf32>
    %183 = vector.shape_cast %182 : vector<8xf32> to vector<8x1xf32>
    %184 = vector.broadcast %183 : vector<8x1xf32> to vector<8x128xf32>
    %185 = arith.subf %181, %184 : vector<8x128xf32>
    %186 = math.exp %185 : vector<8x128xf32>
    %cst_94 = arith.constant dense<0.000000e+00> : vector<8xf32>
    %187 = vector.multi_reduction <add>, %186, %cst_94 [1] : vector<8x128xf32> to vector<8xf32>
    %188 = vector.shape_cast %187 : vector<8xf32> to vector<8x1xf32>
    %189 = math.log %188 : vector<8x1xf32>
    %190 = vector.broadcast %189 : vector<8x1xf32> to vector<8x128xf32>
    %191 = arith.subf %185, %190 : vector<8x128xf32>
    %c7_95 = arith.constant 7 : index
    %c0_96 = arith.constant 0 : index
    %c0_97 = arith.constant 0 : index
    %192 = vector.load %arg5[%c7_95, %c0_96, %c0_97] : memref<8x8x128xf32, #tpu.memory_space<vmem>>, vector<1x8x128xf32>
    %193 = vector.shape_cast %192 : vector<1x8x128xf32> to vector<8x128xf32>
    %194 = vector.shape_cast %191 : vector<8x128xf32> to vector<1x8x128xf32>
    tpu.vector_store %arg5[%c7_95, %c0_96, %c0_97], %194 {strides = array<i32>} : memref<8x8x128xf32, #tpu.memory_space<vmem>>, vector<1x8x128xf32>,
    %195 = arith.truncf %180 : vector<8x128xf32> to vector<8x128xbf16>
    %c0_98 = arith.constant 0 : index
    %c0_99 = arith.constant 0 : index
    %196 = vector.load %arg7[%c0_98, %c0_99] : memref<8x128xbf16, #tpu.memory_space<vmem>>, vector<8x128xbf16>
    tpu.vector_store %arg7[%c0_98, %c0_99], %195 {strides = array<i32>} : memref<8x128xbf16, #tpu.memory_space<vmem>>, vector<8x128xbf16>,
    %c0_i32_100 = arith.constant 0 : i32
    %197 = arith.cmpi eq, %arg0, %c0_i32_100 : i32
    %198 = arith.extui %197 : i1 to i32
    %c0_i32_101 = arith.constant 0 : i32
    %199 = arith.cmpi ne, %198, %c0_i32_101 : i32
    scf.if %199 {
      %c0_102 = arith.constant 0 : index
      %c0_103 = arith.constant 0 : index
      %200 = vector.load %arg6[%c0_102, %c0_103] : memref<8x128xf32, #tpu.memory_space<vmem>>, vector<8x128xf32>
      tpu.vector_store %arg6[%c0_102, %c0_103], %180 {strides = array<i32>} : memref<8x128xf32, #tpu.memory_space<vmem>>, vector<8x128xf32>,
    } else {
    }
    return
  }
  func.func @transform_0(%arg0: i32) -> (i32, i32, i32) {
    %c0_i32 = arith.constant 0 : i32
    %c0_i32_0 = arith.constant 0 : i32
    %c0_i32_1 = arith.constant 0 : i32
    return %arg0, %c0_i32, %c0_i32_0 : i32, i32, i32
  }
  func.func @transform_1(%arg0: i32) -> (i32, i32) {
    %c0_i32 = arith.constant 0 : i32
    %c0_i32_0 = arith.constant 0 : i32
    %c0_i32_1 = arith.constant 0 : i32
    return %c0_i32, %c0_i32_0 : i32, i32
  }
  func.func @transform_2(%arg0: i32) -> (i32, i32) {
    %c0_i32 = arith.constant 0 : i32
    %c0_i32_0 = arith.constant 0 : i32
    %c0_i32_1 = arith.constant 0 : i32
    return %c0_i32, %c0_i32_0 : i32, i32
  }
  func.func @transform_3(%arg0: i32) -> (i32, i32) {
    %c0_i32 = arith.constant 0 : i32
    %c0_i32_0 = arith.constant 0 : i32
    %c0_i32_1 = arith.constant 0 : i32
    return %c0_i32, %c0_i32_0 : i32, i32
  }
  func.func @transform_4(%arg0: i32) -> (i32, i32, i32) {
    %c0_i32 = arith.constant 0 : i32
    %c0_i32_0 = arith.constant 0 : i32
    %c0_i32_1 = arith.constant 0 : i32
    return %arg0, %c0_i32, %c0_i32_0 : i32, i32, i32
  }
  func.func @transform_5(%arg0: i32) -> (i32, i32) {
    %c0_i32 = arith.constant 0 : i32
    %c0_i32_0 = arith.constant 0 : i32
    %c0_i32_1 = arith.constant 0 : i32
    return %c0_i32, %c0_i32_0 : i32, i32
  }
}

</mosaic_0001>

<bundles_post_ra>
// kernel: tpu_custom_call.1
= control target key start
LH: loop header
LB: loop body
LE: loop exit
PB: predicated region body
PF: predicated region fallthrough
CT: control target
= control target key end

     0   :  { %11 = vsyncpa [#allocation4], 0  ;;  %s2112_s0 = inlined_call_operand.hbm [shape: f32[8,8,256], index: 0, kind: input, shape index: {}]   ;;  %s2113_s1 = inlined_call_operand.hbm [shape: bf16[8,128], index: 1, kind: input, shape index: {}]   ;;  %s2114_s2 = inlined_call_operand.hbm [shape: bf16[128,256], index: 2, kind: input, shape index: {}]   ;;  %s2115_s3 = inlined_call_operand.vmem [shape: f32[1,256], index: 3, kind: input, shape index: {}]   ;;  %s2116_s4 = inlined_call_operand.hbm [shape: f32[8,8,128], index: 4, kind: output, shape index: {0}]   ;;  %s2117_s5 = inlined_call_operand.hbm [shape: f32[8,128], index: 5, kind: output, shape index: {1}]  }
   0x1   :  { %12 = vsyncpa [#allocation7], 0 }
   0x2   :  { %13 = vsyncpa [#allocation5], 0 }
   0x3   :  { %14 = vsyncpa [#allocation11], 0  ;;  %s1767_s18 = smov [#allocation6]   ;;  %s1768_s20 = smov [#allocation3]  }
   0x4   :  { %s33_s19 = sshll.u32 %s1767_s18, 4  ;;  %s20_s21 = sshll.u32 %s1768_s20, 4  ;;  %s34_s19 = int_to_ptr.vmem [resolvable:$true] %s33_s19  ;;  %s1807_s21 = int_to_ptr.vmem [resolvable:$true] %s20_s21 }
   0x5   :  { %s1649_s24 = scalar_lea.hbm %s2113_s1, 64 }
   0x6   :  { %p1650_p0 = scmp.ne.s32.totalorder %s2113_s1, %s1649_s24  ;;  %p1653_p1 = scmp.lt.u32.totalorder %s1649_s24, %s2113_s1 }
   0x8   :  { %p1655_p2 = pnand %p1653_p1, %p1650_p0 }
   0xa   :  { %1658 = shalt.err (!%p1655_p2)
}
   0xb   :  { %s1659_s29 = scalar_lea.vmem %s34_s19, 64  ;;  %p1664_p4 = scmp.lt.s32.totalorder %s34_s19, %s34_s19 }
   0xc   :  { %p1660_p3 = scmp.ne.s32.totalorder %s34_s19, %s1659_s29  ;;  %p1665_p5 = scmp.lt.s32.totalorder %s1659_s29, %s1659_s29 }
   0xe   :  { %p1666_p6 = por %p1665_p5, %p1664_p4 }
  0x10   :  { %p1667_p7 = pnand %p1666_p6, %p1660_p3 }
  0x12   :  { %1670 = shalt.err (!%p1667_p7)
}
  0x13   :  { %36 = dma.hbm_to_vmem [thread:$0]  %s2113_s1, 64, %s34_s19, [#allocation7]  }
  0x14   :  { %s1671_s9 = scalar_lea.hbm %s2112_s0, 2048 }
  0x15   :  { %p1672_p8 = scmp.ne.s32.totalorder %s2112_s0, %s1671_s9  ;;  %p1675_p9 = scmp.lt.u32.totalorder %s1671_s9, %s2112_s0 }
  0x17   :  { %p1677_p10 = pnand %p1675_p9, %p1672_p8 }
  0x19   :  { %1680 = shalt.err (!%p1677_p10)
}
  0x1a   :  { %s1681_s14 = scalar_lea.vmem %s1807_s21, 2048  ;;  %p1686_p12 = scmp.lt.s32.totalorder %s1807_s21, %s1807_s21 }
  0x1b   :  { %p1682_p11 = scmp.ne.s32.totalorder %s1807_s21, %s1681_s14  ;;  %p1687_p13 = scmp.lt.s32.totalorder %s1681_s14, %s1681_s14 }
  0x1d   :  { %p1688_p0 = por %p1687_p13, %p1686_p12 }
  0x1f   :  { %p1689_p1 = pnand %p1688_p0, %p1682_p11 }
  0x21   :  { %1692 = shalt.err (!%p1689_p1)
}
  0x22   :  { %s1769_s1 = smov 256   ;;  %s1770_s15 = smov 16  }
  0x23   :  { %26 = dma.hbm_to_vmem [thread:$0]  %s2112_s0, 2048, %s1807_s21, [#allocation4], %s1769_s1, %s1769_s1, %s1770_s15  }
  0x24   :  { %s1771_s18 = smov [#allocation8]   ;;  %s1693_s23 = scalar_lea.hbm %s2114_s2, 2048 }
  0x25   :  { %s42_s19 = sshll.u32 %s1771_s18, 4  ;;  %p1694_p2 = scmp.ne.s32.totalorder %s2114_s2, %s1693_s23  ;;  %s43_s19 = int_to_ptr.vmem [resolvable:$true] %s42_s19 }
  0x26   :  { %p1697_p3 = scmp.lt.u32.totalorder %s1693_s23, %s2114_s2 }
  0x28   :  { %p1699_p4 = pnand %p1697_p3, %p1694_p2 }
  0x2a   :  { %1702 = shalt.err (!%p1699_p4)
}
  0x2b   :  { %s1703_s28 = scalar_lea.vmem %s43_s19, 2048  ;;  %p1708_p6 = scmp.lt.s32.totalorder %s43_s19, %s43_s19 }
  0x2c   :  { %p1704_p5 = scmp.ne.s32.totalorder %s43_s19, %s1703_s28  ;;  %p1709_p7 = scmp.lt.s32.totalorder %s1703_s28, %s1703_s28 }
  0x2e   :  { %p1710_p8 = por %p1709_p7, %p1708_p6 }
  0x30   :  { %p1711_p9 = pnand %p1710_p8, %p1704_p5 }
  0x32   :  { %1714 = shalt.err (!%p1711_p9)
}
  0x33   :  { %s1772_s0 = smov 128   ;;  %s1773_s21 = smov 8  }
  0x34   :  { %48 = dma.hbm_to_vmem [thread:$0]  %s2114_s2, 2048, %s43_s19, [#allocation7], %s1772_s0, %s1772_s0, %s1773_s21  }
  0x35   :  { %1759 = dma.done.wait [#allocation4], 2048  }
  0x36   :  { %1760 = vsyncadd [#allocation4], 4294965248 }
  0x37   :  { %1761 = dma.done.wait [#allocation7], 2112  }
  0x38   :  { %1762 = vsyncadd [#allocation7], 4294965184  ;;  %v1774_v0 = vmov 0   ;;  %v1855_v1 = vld [vmem:[#allocation8 + $0x4] ss:$8 sps:$4 sm:$0xff]   ;;  %v211_v19 = vlaneseq  ;;  %v68_v24 = vld [vmem:[#allocation3] sm:$0xff] }
  0x39   :  { %198 = vmatprep.mubr.bf16.mxu0 %v1774_v0  ;;  %366 = vmatprep.mubr.bf16.mxu1 %v1774_v0  ;;  %v1857_v2 = vld [vmem:[#allocation8] ss:$8 sps:$4 sm:$0xff]   ;;  %v1860_v3 = vld [vmem:[#allocation8 + $0x14] ss:$8 sps:$4 sm:$0xff]   ;;  %v1864_v4 = vld [vmem:[#allocation8 + $0x10] ss:$8 sps:$4 sm:$0xff]  }
  0x3a   :  { %166 = vmatprep.subr.bf16.mxu0 %v1855_v1  ;;  %334 = vmatprep.subr.bf16.mxu1 %v1855_v1  ;;  %v1868_v5 = vld [vmem:[#allocation8 + $0x24] ss:$8 sps:$4 sm:$0xff]   ;;  %v1872_v6 = vld [vmem:[#allocation8 + $0x20] ss:$8 sps:$4 sm:$0xff]   ;;  %v1876_v7 = vld [vmem:[#allocation8 + $0x34] ss:$8 sps:$4 sm:$0xff]  }
  0x3b   :  { %167 = vmatpush1.bf16.msra.mxu0 %v1857_v2  ;;  %335 = vmatpush1.bf16.msra.mxu1 %v1857_v2  ;;  %v65_v8 = vld [vmem:[#allocation6] sm:$0xf]  ;;  %v1880_v9 = vld [vmem:[#allocation8 + $0x30] ss:$8 sps:$4 sm:$0xff]   ;;  %v1884_v10 = vld [vmem:[#allocation8 + $0x44] ss:$8 sps:$4 sm:$0xff]  }
  0x3c   :  { %168 = vmatprep.subr.bf16.mxu0 %v1860_v3  ;;  %336 = vmatprep.subr.bf16.mxu1 %v1860_v3  ;;  %66 = vst [vmem:[#allocation2] sm:$0xf] %v65_v8  ;;  %v1888_v11 = vld [vmem:[#allocation8 + $0x40] ss:$8 sps:$4 sm:$0xff]   ;;  %v1892_v12 = vld [vmem:[#allocation8 + $0x54] ss:$8 sps:$4 sm:$0xff]  }
  0x3d   :  { %v1896_v13 = vld [vmem:[#allocation8 + $0x50] ss:$8 sps:$4 sm:$0xff]   ;;  %v1900_v14 = vld [vmem:[#allocation8 + $0x64] ss:$8 sps:$4 sm:$0xff]   ;;  %v1904_v15 = vld [vmem:[#allocation8 + $0x60] ss:$8 sps:$4 sm:$0xff]  }
  0x3e   :  { %v1908_v16 = vld [vmem:[#allocation8 + $0x74] ss:$8 sps:$4 sm:$0xff]   ;;  %v1912_v17 = vld [vmem:[#allocation8 + $0x70] ss:$8 sps:$4 sm:$0xff]   ;;  %v212_v20 = vshrl.u32 %v211_v19, 7  ;;  %v69_v26 = vld [vmem:[#allocation3 + $0x8] sm:$0xff] }
  0x3f   :  { %169 = vmatpush1.bf16.msra.mxu0 %v1864_v4  ;;  %337 = vmatpush1.bf16.msra.mxu1 %v1864_v4  ;;  %v209_v22 = vld [vmem:[%s2115_s3] sm:$0x3]  ;;  %v236_v38 = vld [vmem:[#allocation3 + $0x10] sm:$0xff]  ;;  %v405_v52 = vld [vmem:[#allocation3 + $0x20] sm:$0xff] }
  0x40   :  { %170 = vmatprep.subr.bf16.mxu0 %v1868_v5  ;;  %338 = vmatprep.subr.bf16.mxu1 %v1868_v5  ;;  %v1938_v21 = vsub.s32 0, %v212_v20  ;;  %v1943_v23 = vsub.s32 1, %v212_v20  ;;  %v377_v37 = vld [vmem:[%s2115_s3] sm:$0x3]  ;;  %v406_v54 = vld [vmem:[#allocation3 + $0x28] sm:$0xff]  ;;  %v574_v19 = vld [vmem:[#allocation3 + $0x30] sm:$0xff] }
  0x41   :  { %v237_v40 = vld [vmem:[#allocation3 + $0x18] sm:$0xff] }
  0x42   :  { %v214_v25 = vrot.slane %v209_v22, %v1938_v21  ;;  %v218_v28 = vrot.slane %v209_v22, %v1943_v23  ;;  %v382_v39 = vrot.slane %v377_v37, %v1938_v21  ;;  %v386_v42 = vrot.slane %v377_v37, %v1943_v23  ;;  %v546_v51 = vld [vmem:[%s2115_s3] sm:$0x3]  ;;  %v744_v37 = vld [vmem:[#allocation3 + $0x48] sm:$0xff] }
  0x43   :  { %171 = vmatpush1.bf16.msra.mxu0 %v1872_v6  ;;  %339 = vmatpush1.bf16.msra.mxu1 %v1872_v6  ;;  %v67_v18 = vld [vmem:[#allocation2] sm:$0xf]  ;;  %v551_v53 = vrot.slane %v546_v51, %v1938_v21  ;;  %v555_v56 = vrot.slane %v546_v51, %v1943_v23 }
  0x44   :  { %172 = vmatprep.subr.bf16.mxu0 %v1876_v7  ;;  %340 = vmatprep.subr.bf16.mxu1 %v1876_v7  ;;  %v575_v22 = vld [vmem:[#allocation3 + $0x38] sm:$0xff] }
  0x47   :  { %173 = vmatpush1.bf16.msra.mxu0 %v1880_v9  ;;  %341 = vmatpush1.bf16.msra.mxu1 %v1880_v9 }
  0x48   :  { %174 = vmatprep.subr.bf16.mxu0 %v1884_v10  ;;  %342 = vmatprep.subr.bf16.mxu1 %v1884_v10 }
  0x4b   :  { %175 = vmatpush1.bf16.msra.mxu0 %v1888_v11  ;;  %343 = vmatpush1.bf16.msra.mxu1 %v1888_v11 }
  0x4c   :  { %176 = vmatprep.subr.bf16.mxu0 %v1892_v12  ;;  %344 = vmatprep.subr.bf16.mxu1 %v1892_v12 }
  0x4f   :  { %177 = vmatpush1.bf16.msra.mxu0 %v1896_v13  ;;  %345 = vmatpush1.bf16.msra.mxu1 %v1896_v13 }
  0x50   :  { %178 = vmatprep.subr.bf16.mxu0 %v1900_v14  ;;  %346 = vmatprep.subr.bf16.mxu1 %v1900_v14 }
  0x53   :  { %179 = vmatpush1.bf16.msra.mxu0 %v1904_v15  ;;  %347 = vmatpush1.bf16.msra.mxu1 %v1904_v15 }
  0x54   :  { %180 = vmatprep.subr.bf16.mxu0 %v1908_v16  ;;  %348 = vmatprep.subr.bf16.mxu1 %v1908_v16 }
  0x57   :  { %181 = vmatpush1.bf16.msra.mxu0 %v1912_v17  ;;  %349 = vmatpush1.bf16.msra.mxu1 %v1912_v17 }
  0x58   :  { %503 = vmatprep.subr.bf16.mxu0 %v1855_v1  ;;  %672 = vmatprep.subr.bf16.mxu1 %v1855_v1 }
  0x5a   :  { %199 = vmatmul.mubr.bf16.vlgmr.msra.gmra.mrb[0].mxu0 %v67_v18  ;;  %v715_v18 = vld [vmem:[%s2115_s3] sm:$0x3] }
  0x5b   :  { %504 = vmatpush1.bf16.msra.mxu0 %v1857_v2  ;;  %535 = vmatprep.mubr.bf16.mxu0 %v1774_v0  ;;  %v720_v20 = vrot.slane %v715_v18, %v1938_v21 }
  0x5c   :  { %505 = vmatprep.subr.bf16.mxu0 %v1860_v3 }
  0x5f   :  { %506 = vmatpush1.bf16.msra.mxu0 %v1864_v4 }
  0x60   :  { %507 = vmatprep.subr.bf16.mxu0 %v1868_v5 }
  0x63   :  { %508 = vmatpush1.bf16.msra.mxu0 %v1872_v6 }
  0x64   :  { %509 = vmatprep.subr.bf16.mxu0 %v1876_v7 }
  0x67   :  { %510 = vmatpush1.bf16.msra.mxu0 %v1880_v9 }
  0x68   :  { %511 = vmatprep.subr.bf16.mxu0 %v1884_v10 }
  0x6b   :  { %512 = vmatpush1.bf16.msra.mxu0 %v1888_v11 }
  0x6c   :  { %513 = vmatprep.subr.bf16.mxu0 %v1892_v12 }
  0x6f   :  { %514 = vmatpush1.bf16.msra.mxu0 %v1896_v13 }
  0x70   :  { %515 = vmatprep.subr.bf16.mxu0 %v1900_v14 }
  0x73   :  { %516 = vmatpush1.bf16.msra.mxu0 %v1904_v15 }
  0x74   :  { %517 = vmatprep.subr.bf16.mxu0 %v1908_v16 }
  0x77   :  { %518 = vmatpush1.bf16.msra.mxu0 %v1912_v17 }
  0x78   :  { %841 = vmatprep.subr.bf16.mxu0 %v1855_v1 }
 0x12d   :  { %v200_v27 = vpop.f32.mrb[0].mxu0 }
 0x12e   :  { %v207_v29 = vadd.f32 %v200_v27, %v68_v24  ;;  %v202_v30 = vpop.f32.mrb[1].mxu0 }
 0x12f   :  { %v208_v31 = vadd.f32 %v202_v30, %v69_v26  ;;  %v204_v32 = vpop.f32.mrb[2].mxu0 }
 0x130   :  { %v221_v33 = vadd.f32 %v214_v25, %v207_v29  ;;  %v205_v34 = vpop.f32.mrb[3].mxu0  ;;  %v724_v25 = vrot.slane %v715_v18, %v1943_v23 }
 0x131   :  { %v1947_v35 = vadd.f32 %v218_v28, %v208_v31  ;;  %v743_v34 = vld [vmem:[#allocation3 + $0x40] sm:$0xff] }
 0x132   :  { %v234_v36 = vpack.c.bf16 %v221_v33, %v221_v33  ;;  %v884_v33 = vld [vmem:[%s2115_s3] sm:$0x3] }
 0x133   :  { %223 = vmax.xlane.f32.xlu0 %v1947_v35 }
 0x134   :  { %367 = vmatmul.mubr.bf16.vlgmr.msra.gmra.mrb[0].mxu1 %v234_v36  ;;  %v889_v36 = vrot.slane %v884_v33, %v1938_v21 }
 0x135   :  { %673 = vmatpush1.bf16.msra.mxu1 %v1857_v2  ;;  %704 = vmatprep.mubr.bf16.mxu1 %v1774_v0 }
 0x136   :  { %674 = vmatprep.subr.bf16.mxu1 %v1860_v3 }
 0x139   :  { %675 = vmatpush1.bf16.msra.mxu1 %v1864_v4 }
 0x13a   :  { %676 = vmatprep.subr.bf16.mxu1 %v1868_v5 }
 0x13d   :  { %677 = vmatpush1.bf16.msra.mxu1 %v1872_v6 }
 0x13e   :  { %678 = vmatprep.subr.bf16.mxu1 %v1876_v7 }
 0x141   :  { %679 = vmatpush1.bf16.msra.mxu1 %v1880_v9 }
 0x142   :  { %680 = vmatprep.subr.bf16.mxu1 %v1884_v10 }
 0x145   :  { %681 = vmatpush1.bf16.msra.mxu1 %v1888_v11 }
 0x146   :  { %682 = vmatprep.subr.bf16.mxu1 %v1892_v12 }
 0x149   :  { %683 = vmatpush1.bf16.msra.mxu1 %v1896_v13 }
 0x14a   :  { %684 = vmatprep.subr.bf16.mxu1 %v1900_v14 }
 0x14d   :  { %685 = vmatpush1.bf16.msra.mxu1 %v1904_v15 }
 0x14e   :  { %686 = vmatprep.subr.bf16.mxu1 %v1908_v16 }
 0x151   :  { %687 = vmatpush1.bf16.msra.mxu1 %v1912_v17 }
 0x152   :  { %1010 = vmatprep.subr.bf16.mxu1 %v1855_v1 }
 0x207   :  { %v368_v41 = vpop.f32.mrb[0].mxu1 }
 0x208   :  { %v375_v43 = vadd.f32 %v368_v41, %v236_v38  ;;  %v370_v44 = vpop.f32.mrb[1].mxu1 }
 0x209   :  { %v376_v45 = vadd.f32 %v370_v44, %v237_v40  ;;  %v372_v46 = vpop.f32.mrb[2].mxu1 }
 0x20a   :  { %v389_v47 = vadd.f32 %v382_v39, %v375_v43  ;;  %v373_v48 = vpop.f32.mrb[3].mxu1  ;;  %v893_v39 = vrot.slane %v884_v33, %v1943_v23 }
 0x20b   :  { %v1972_v49 = vadd.f32 %v386_v42, %v376_v45 }
 0x20c   :  { %v403_v50 = vpack.c.bf16 %v389_v47, %v389_v47 }
 0x20d   :  { %391 = vmax.xlane.f32.xlu0 %v1972_v49 }
 0x20e   :  { %536 = vmatmul.mubr.bf16.vlgmr.msra.gmra.mrb[4].mxu0 %v403_v50 }
 0x20f   :  { %842 = vmatpush1.bf16.msra.mxu0 %v1857_v2  ;;  %873 = vmatprep.mubr.bf16.mxu0 %v1774_v0 }
 0x210   :  { %843 = vmatprep.subr.bf16.mxu0 %v1860_v3 }
 0x213   :  { %844 = vmatpush1.bf16.msra.mxu0 %v1864_v4 }
 0x214   :  { %845 = vmatprep.subr.bf16.mxu0 %v1868_v5 }
 0x217   :  { %846 = vmatpush1.bf16.msra.mxu0 %v1872_v6 }
 0x218   :  { %847 = vmatprep.subr.bf16.mxu0 %v1876_v7 }
 0x21b   :  { %848 = vmatpush1.bf16.msra.mxu0 %v1880_v9 }
 0x21c   :  { %849 = vmatprep.subr.bf16.mxu0 %v1884_v10 }
 0x21f   :  { %850 = vmatpush1.bf16.msra.mxu0 %v1888_v11 }
 0x220   :  { %851 = vmatprep.subr.bf16.mxu0 %v1892_v12 }
 0x223   :  { %852 = vmatpush1.bf16.msra.mxu0 %v1896_v13 }
 0x224   :  { %853 = vmatprep.subr.bf16.mxu0 %v1900_v14 }
 0x227   :  { %854 = vmatpush1.bf16.msra.mxu0 %v1904_v15 }
 0x228   :  { %855 = vmatprep.subr.bf16.mxu0 %v1908_v16 }
 0x22b   :  { %856 = vmatpush1.bf16.msra.mxu0 %v1912_v17 }
 0x22c   :  { %1179 = vmatprep.subr.bf16.mxu0 %v1855_v1 }
 0x2e1   :  { %v537_v55 = vpop.f32.mrb[4].mxu0 }
 0x2e2   :  { %v544_v57 = vadd.f32 %v537_v55, %v405_v52  ;;  %v539_v58 = vpop.f32.mrb[5].mxu0  ;;  %v1081_v55 = vld [vmem:[#allocation3 + $0x60] sm:$0xff] }
 0x2e3   :  { %v545_v59 = vadd.f32 %v539_v58, %v406_v54  ;;  %v541_v60 = vpop.f32.mrb[6].mxu0  ;;  %v1222_v54 = vld [vmem:[%s2115_s3] sm:$0x3] }
 0x2e4   :  { %v558_v61 = vadd.f32 %v551_v53, %v544_v57  ;;  %v542_v62 = vpop.f32.mrb[7].mxu0  ;;  %v1227_v58 = vrot.slane %v1222_v54, %v1938_v21 }
 0x2e5   :  { %v1997_v63 = vadd.f32 %v555_v56, %v545_v59  ;;  %v1082_v59 = vld [vmem:[#allocation3 + $0x68] sm:$0xff] }
 0x2e6   :  { %v572_v8 = vpack.c.bf16 %v558_v61, %v558_v61 }
 0x2e7   :  { %560 = vmax.xlane.f32.xlu1 %v1997_v63 }
 0x2e8   :  { %705 = vmatmul.mubr.bf16.vlgmr.msra.gmra.mrb[4].mxu1 %v572_v8 }
 0x2e9   :  { %1011 = vmatpush1.bf16.msra.mxu1 %v1857_v2  ;;  %1042 = vmatprep.mubr.bf16.mxu1 %v1774_v0 }
 0x2ea   :  { %1012 = vmatprep.subr.bf16.mxu1 %v1860_v3 }
 0x2ed   :  { %1013 = vmatpush1.bf16.msra.mxu1 %v1864_v4 }
 0x2ee   :  { %1014 = vmatprep.subr.bf16.mxu1 %v1868_v5 }
 0x2f1   :  { %1015 = vmatpush1.bf16.msra.mxu1 %v1872_v6 }
 0x2f2   :  { %1016 = vmatprep.subr.bf16.mxu1 %v1876_v7 }
 0x2f5   :  { %1017 = vmatpush1.bf16.msra.mxu1 %v1880_v9 }
 0x2f6   :  { %1018 = vmatprep.subr.bf16.mxu1 %v1884_v10 }
 0x2f9   :  { %1019 = vmatpush1.bf16.msra.mxu1 %v1888_v11 }
 0x2fa   :  { %1020 = vmatprep.subr.bf16.mxu1 %v1892_v12 }
 0x2fd   :  { %1021 = vmatpush1.bf16.msra.mxu1 %v1896_v13 }
 0x2fe   :  { %1022 = vmatprep.subr.bf16.mxu1 %v1900_v14 }
 0x301   :  { %1023 = vmatpush1.bf16.msra.mxu1 %v1904_v15 }
 0x302   :  { %1024 = vmatprep.subr.bf16.mxu1 %v1908_v16 }
 0x305   :  { %1025 = vmatpush1.bf16.msra.mxu1 %v1912_v17 }
 0x306   :  { %1348 = vmatprep.subr.bf16.mxu1 %v1855_v1 }
 0x374   :  { %v561_v50 = vpop.xlane.xlu1 %560 }
 0x375   :  { %v562_v52 = vsub.f32 %v1997_v63, %v561_v50 }
 0x377   :  { %v563_v56 = vmul.f32 1.442695, %v562_v52 }
 0x3bb   :  { %v706_v24 = vpop.f32.mrb[4].mxu1 }
 0x3bc   :  { %v713_v26 = vadd.f32 %v706_v24, %v574_v19  ;;  %v708_v27 = vpop.f32.mrb[5].mxu1 }
 0x3bd   :  { %v714_v28 = vadd.f32 %v708_v27, %v575_v22  ;;  %v710_v29 = vpop.f32.mrb[6].mxu1 }
 0x3be   :  { %v727_v30 = vadd.f32 %v720_v20, %v713_v26  ;;  %v711_v31 = vpop.f32.mrb[7].mxu1 }
 0x3bf   :  { %v2022_v32 = vadd.f32 %v724_v25, %v714_v28 }
 0x3c0   :  { %v741_v1 = vpack.c.bf16 %v727_v30, %v727_v30 }
 0x3c1   :  { %729 = vmax.xlane.f32.xlu1 %v2022_v32 }
 0x3c2   :  { %874 = vmatmul.mubr.bf16.vlgmr.msra.gmra.mrb[8].mxu0 %v741_v1 }
 0x3c3   :  { %1180 = vmatpush1.bf16.msra.mxu0 %v1857_v2  ;;  %1211 = vmatprep.mubr.bf16.mxu0 %v1774_v0 }
 0x3c4   :  { %1181 = vmatprep.subr.bf16.mxu0 %v1860_v3 }
 0x3c7   :  { %1182 = vmatpush1.bf16.msra.mxu0 %v1864_v4 }
 0x3c8   :  { %1183 = vmatprep.subr.bf16.mxu0 %v1868_v5 }
 0x3cb   :  { %1184 = vmatpush1.bf16.msra.mxu0 %v1872_v6 }
 0x3cc   :  { %1185 = vmatprep.subr.bf16.mxu0 %v1876_v7 }
 0x3cf   :  { %1186 = vmatpush1.bf16.msra.mxu0 %v1880_v9 }
 0x3d0   :  { %1187 = vmatprep.subr.bf16.mxu0 %v1884_v10 }
 0x3d3   :  { %1188 = vmatpush1.bf16.msra.mxu0 %v1888_v11 }
 0x3d4   :  { %1189 = vmatprep.subr.bf16.mxu0 %v1892_v12 }
 0x3d7   :  { %1190 = vmatpush1.bf16.msra.mxu0 %v1896_v13 }
 0x3d8   :  { %1191 = vmatprep.subr.bf16.mxu0 %v1900_v14 }
 0x3db   :  { %1192 = vmatpush1.bf16.msra.mxu0 %v1904_v15 }
 0x3dc   :  { %1193 = vmatprep.subr.bf16.mxu0 %v1908_v16 }
 0x3df   :  { %1194 = vmatpush1.bf16.msra.mxu0 %v1912_v17 }
 0x495   :  { %v875_v38 = vpop.f32.mrb[8].mxu0 }
 0x496   :  { %v882_v40 = vadd.f32 %v875_v38, %v743_v34  ;;  %v877_v41 = vpop.f32.mrb[9].mxu0 }
 0x497   :  { %v883_v42 = vadd.f32 %v877_v41, %v744_v37  ;;  %v879_v43 = vpop.f32.mrb[10].mxu0 }
 0x498   :  { %v896_v44 = vadd.f32 %v889_v36, %v882_v40  ;;  %v880_v45 = vpop.f32.mrb[11].mxu0 }
 0x499   :  { %v897_v46 = vadd.f32 %v893_v39, %v883_v42 }
 0x49a   :  { %v910_v47 = vpack.c.bf16 %v896_v44, %v896_v44 }
 0x49b   :  { %898 = vmax.xlane.f32.xlu0 %v897_v46 }
 0x49c   :  { %1043 = vmatmul.mubr.bf16.vlgmr.msra.gmra.mrb[8].mxu1 %v910_v47 }
 0x49d   :  { %1349 = vmatpush1.bf16.msra.mxu1 %v1857_v2  ;;  %1380 = vmatprep.mubr.bf16.mxu1 %v1774_v0  ;;  %v1053_v0 = vld [vmem:[%s2115_s3] sm:$0x3]  ;;  %v912_v2 = vld [vmem:[#allocation3 + $0x50] sm:$0xff] }
 0x49e   :  { %1350 = vmatprep.subr.bf16.mxu1 %v1860_v3  ;;  %v1058_v3 = vrot.slane %v1053_v0, %v1938_v21 }
 0x4a1   :  { %1351 = vmatpush1.bf16.msra.mxu1 %v1864_v4  ;;  %v913_v4 = vld [vmem:[#allocation3 + $0x58] sm:$0xff] }
 0x4a2   :  { %1352 = vmatprep.subr.bf16.mxu1 %v1868_v5 }
 0x4a5   :  { %1353 = vmatpush1.bf16.msra.mxu1 %v1872_v6  ;;  %v1062_v6 = vrot.slane %v1053_v0, %v1943_v23 }
 0x4a6   :  { %1354 = vmatprep.subr.bf16.mxu1 %v1876_v7 }
 0x4a9   :  { %1355 = vmatpush1.bf16.msra.mxu1 %v1880_v9 }
 0x4aa   :  { %1356 = vmatprep.subr.bf16.mxu1 %v1884_v10 }
 0x4ad   :  { %1357 = vmatpush1.bf16.msra.mxu1 %v1888_v11 }
 0x4ae   :  { %1358 = vmatprep.subr.bf16.mxu1 %v1892_v12 }
 0x4b1   :  { %1359 = vmatpush1.bf16.msra.mxu1 %v1896_v13 }
 0x4b2   :  { %1360 = vmatprep.subr.bf16.mxu1 %v1900_v14 }
 0x4b5   :  { %1361 = vmatpush1.bf16.msra.mxu1 %v1904_v15 }
 0x4b6   :  { %1362 = vmatprep.subr.bf16.mxu1 %v1908_v16  ;;  %v224_v16 = vpop.xlane.xlu0 %223 }
 0x4b9   :  { %1363 = vmatpush1.bf16.msra.mxu1 %v1912_v17  ;;  %v225_v17 = vsub.f32 %v1947_v35, %v224_v16  ;;  %v1231_v35 = vrot.slane %v1222_v54, %v1943_v23 }
 0x4ba   :  { %v392_v48 = vpop.xlane.xlu0 %391 }
 0x4bb   :  { %v226_v51 = vmul.f32 1.442695, %v225_v17  ;;  %v393_v45 = vsub.f32 %v1972_v49, %v392_v48 }
 0x4bd   :  { %1617 = vpow2.f32 %v226_v51  ;;  %v394_v47 = vmul.f32 1.442695, %v393_v45 }
 0x4be   :  { %1619 = vpow2.f32 %v563_v56 }
 0x4c7   :  { %v1618_v25 = vpop.eup %1617 }
 0x4c8   :  { %v1620_v26 = vpop.eup %1619 }
 0x528   :  { %v899_v53 = vpop.xlane.xlu0 %898 }
 0x529   :  { %v900_v57 = vsub.f32 %v897_v46, %v899_v53  ;;  %v730_v46 = vpop.xlane.xlu1 %729 }
 0x52a   :  { %v731_v0 = vsub.f32 %v2022_v32, %v730_v46 }
 0x52b   :  { %v901_v63 = vmul.f32 1.442695, %v900_v57 }
 0x52d   :  { %1621 = vpow2.f32 %v901_v63 }
 0x537   :  { %v1622_v27 = vpop.eup %1621 }
 0x56f   :  { %v1044_v5 = vpop.f32.mrb[8].mxu1 }
 0x570   :  { %v1051_v7 = vadd.f32 %v1044_v5, %v912_v2  ;;  %v1046_v9 = vpop.f32.mrb[9].mxu1  ;;  %v732_v5 = vmul.f32 1.442695, %v731_v0 }
 0x571   :  { %v1052_v10 = vadd.f32 %v1046_v9, %v913_v4  ;;  %v1048_v11 = vpop.f32.mrb[10].mxu1  ;;  %v1250_v4 = vld [vmem:[#allocation3 + $0x70] sm:$0xff]  ;;  %v1251_v9 = vld [vmem:[#allocation3 + $0x78] sm:$0xff] }
 0x572   :  { %v1065_v12 = vadd.f32 %v1058_v3, %v1051_v7  ;;  %v1049_v13 = vpop.f32.mrb[11].mxu1  ;;  %v1391_v3 = vld [vmem:[%s2115_s3] sm:$0x3]  ;;  %s1775_s3 = smov [#allocation10]  }
 0x573   :  { %v2067_v14 = vadd.f32 %v1062_v6, %v1052_v10  ;;  %v1396_v7 = vrot.slane %v1391_v3, %v1938_v21  ;;  %v1400_v49 = vrot.slane %v1391_v3, %v1943_v23  ;;  %s1441_s20 = sshll.u32 %s1775_s3, 4  ;;  %s1442_s20 = int_to_ptr.vmem [resolvable:$true] %s1441_s20 }
 0x574   :  { %v1079_v15 = vpack.c.bf16 %v1065_v12, %v1065_v12  ;;  %s1715_s22 = scalar_lea.vmem %s1442_s20, 128  ;;  %p1720_p11 = scmp.lt.s32.totalorder %s1442_s20, %s1442_s20 }
 0x575   :  { %1067 = vmax.xlane.f32.xlu1 %v2067_v14  ;;  %p1716_p10 = scmp.ne.s32.totalorder %s1442_s20, %s1715_s22  ;;  %p1721_p12 = scmp.lt.s32.totalorder %s1715_s22, %s1715_s22 }
 0x576   :  { %1212 = vmatmul.mubr.bf16.vlgmr.msra.gmra.mrb[12].mxu0 %v1079_v15 }
 0x577   :  { %p1722_p13 = por %p1721_p12, %p1720_p11 }
 0x579   :  { %p1723_p0 = pnand %p1722_p13, %p1716_p10 }
 0x602   :  { %v1068_v2 = vpop.xlane.xlu1 %1067 }
 0x603   :  { %v1069_v6 = vsub.f32 %v2067_v14, %v1068_v2 }
 0x605   :  { %v1070_v15 = vmul.f32 1.442695, %v1069_v6 }
 0x649   :  { %v1213_v60 = vpop.f32.mrb[12].mxu0 }
 0x64a   :  { %v1220_v61 = vadd.f32 %v1213_v60, %v1081_v55  ;;  %v1215_v62 = vpop.f32.mrb[13].mxu0 }
 0x64b   :  { %v1221_v8 = vadd.f32 %v1215_v62, %v1082_v59  ;;  %v1217_v18 = vpop.f32.mrb[14].mxu0 }
 0x64c   :  { %v1234_v19 = vadd.f32 %v1227_v58, %v1220_v61  ;;  %v1218_v20 = vpop.f32.mrb[15].mxu0 }
 0x64d   :  { %v1235_v22 = vadd.f32 %v1231_v35, %v1221_v8 }
 0x64e   :  { %v1248_v24 = vpack.c.bf16 %v1234_v19, %v1234_v19 }
 0x64f   :  { %1236 = vmax.xlane.f32.xlu0 %v1235_v22 }
 0x650   :  { %1381 = vmatmul.mubr.bf16.vlgmr.msra.gmra.mrb[12].mxu1 %v1248_v24 }
 0x653   :  { %228 = vadd.xlane.f32.xlu0 %v1618_v25 }
 0x657   :  { %565 = vadd.xlane.f32.xlu0 %v1620_v26 }
 0x65b   :  { %903 = vadd.xlane.f32.xlu0 %v1622_v27 }
 0x6dc   :  { %v1237_v28 = vpop.xlane.xlu0 %1236 }
 0x6dd   :  { %v1238_v29 = vsub.f32 %v1235_v22, %v1237_v28 }
 0x6df   :  { %v1239_v30 = vmul.f32 1.442695, %v1238_v29 }
 0x6e0   :  { %v229_v31 = vpop.xlane.xlu0 %228 }
 0x6e1   :  { %1623 = vpow2.f32 %v1239_v30 }
 0x6e2   :  { %1625 = vlog2.f32 %v229_v31 }
 0x6e4   :  { %v566_v1 = vpop.xlane.xlu0 %565 }
 0x6e5   :  { %1627 = vlog2.f32 %v566_v1 }
 0x6e8   :  { %v904_v33 = vpop.xlane.xlu0 %903 }
 0x6e9   :  { %1629 = vlog2.f32 %v904_v33 }
 0x6ea   :  { %1631 = vpow2.f32 %v394_v47 }
 0x6eb   :  { %v1624_v34 = vpop.eup %1623  ;;  %1633 = vpow2.f32 %v732_v5 }
 0x6ec   :  { %v1626_v36 = vpop.eup %1625  ;;  %1241 = vadd.xlane.f32.xlu0 %v1624_v34  ;;  %1635 = vpow2.f32 %v1070_v15 }
 0x6ed   :  { %v231_v37 = vmul.f32 0.6931472, %v1626_v36 }
 0x6ef   :  { %v1628_v38 = vpop.eup %1627  ;;  %v232_v39 = vsub.f32 %v225_v17, %v231_v37 }
 0x6f0   :  { %v568_v40 = vmul.f32 0.6931472, %v1628_v38 }
 0x6f1   :  { %233 = vst [vmem:[#allocation9] sm:$0xff] %v232_v39 }
 0x6f2   :  { %v569_v41 = vsub.f32 %v562_v52, %v568_v40 }
 0x6f3   :  { %v1630_v42 = vpop.eup %1629 }
 0x6f4   :  { %571 = vst [vmem:[#allocation9 + $0x10] sm:$0xff] %v569_v41  ;;  %v906_v43 = vmul.f32 0.6931472, %v1630_v42  ;;  %v1632_v14 = vpop.eup %1631 }
 0x6f5   :  { %v1634_v21 = vpop.eup %1633 }
 0x6f6   :  { %v907_v44 = vsub.f32 %v900_v57, %v906_v43  ;;  %v1636_v51 = vpop.eup %1635 }
 0x6f8   :  { %909 = vst [vmem:[#allocation9 + $0x20] sm:$0xff] %v907_v44 }
 0x723   :  { %v1382_v10 = vpop.f32.mrb[12].mxu1 }
 0x724   :  { %v1389_v11 = vadd.f32 %v1382_v10, %v1250_v4  ;;  %v1384_v12 = vpop.f32.mrb[13].mxu1 }
 0x725   :  { %v1390_v13 = vadd.f32 %v1384_v12, %v1251_v9  ;;  %v1386_v32 = vpop.f32.mrb[14].mxu1 }
 0x726   :  { %v1403_v16 = vadd.f32 %v1396_v7, %v1389_v11  ;;  %v1387_v17 = vpop.f32.mrb[15].mxu1 }
 0x727   :  { %v1404_v48 = vadd.f32 %v1400_v49, %v1390_v13 }
 0x728   :  { %v1417_v50 = vpack.c.bf16 %v1403_v16, %v1403_v16  ;;  %1422 = vst [vmem:[#allocation10] sm:$0xff] %v1403_v16 }
 0x729   :  { %1405 = vmax.xlane.f32.xlu1 %v1404_v48 }
 0x72a   :  { %1418 = vst [vmem:[#allocation2] sm:$0xf] %v1417_v50 }
 0x72d   :  { %396 = vadd.xlane.f32.xlu1 %v1632_v14 }
 0x731   :  { %734 = vadd.xlane.f32.xlu1 %v1634_v21 }
 0x735   :  { %1072 = vadd.xlane.f32.xlu1 %v1636_v51 }
 0x779   :  { %v1242_v23 = vpop.xlane.xlu0 %1241 }
 0x77a   :  { %1637 = vlog2.f32 %v1242_v23 }
 0x784   :  { %v1638_v52 = vpop.eup %1637 }
 0x785   :  { %v1244_v53 = vmul.f32 0.6931472, %v1638_v52 }
 0x787   :  { %v1245_v54 = vsub.f32 %v1238_v29, %v1244_v53 }
 0x789   :  { %1247 = vst [vmem:[#allocation9 + $0x30] sm:$0xff] %v1245_v54 }
 0x7b6   :  { %v1406_v55 = vpop.xlane.xlu1 %1405 }
 0x7b7   :  { %v1407_v56 = vsub.f32 %v1404_v48, %v1406_v55 }
 0x7b9   :  { %v1408_v57 = vmul.f32 1.442695, %v1407_v56 }
 0x7ba   :  { %v397_v58 = vpop.xlane.xlu1 %396 }
 0x7bb   :  { %1639 = vpow2.f32 %v1408_v57 }
 0x7bc   :  { %1641 = vlog2.f32 %v397_v58 }
 0x7be   :  { %v735_v59 = vpop.xlane.xlu1 %734 }
 0x7bf   :  { %1643 = vlog2.f32 %v735_v59 }
 0x7c2   :  { %v1073_v60 = vpop.xlane.xlu1 %1072 }
 0x7c3   :  { %1645 = vlog2.f32 %v1073_v60 }
 0x7c5   :  { %v1640_v35 = vpop.eup %1639 }
 0x7c6   :  { %v1642_v61 = vpop.eup %1641  ;;  %1410 = vadd.xlane.f32.xlu1 %v1640_v35 }
 0x7c7   :  { %v399_v62 = vmul.f32 0.6931472, %v1642_v61 }
 0x7c9   :  { %v1644_v8 = vpop.eup %1643  ;;  %v400_v18 = vsub.f32 %v393_v45, %v399_v62 }
 0x7ca   :  { %v737_v63 = vmul.f32 0.6931472, %v1644_v8 }
 0x7cb   :  { %402 = vst [vmem:[#allocation9 + $0x8] sm:$0xff] %v400_v18 }
 0x7cc   :  { %v738_v19 = vsub.f32 %v731_v0, %v737_v63 }
 0x7cd   :  { %v1646_v20 = vpop.eup %1645 }
 0x7ce   :  { %740 = vst [vmem:[#allocation9 + $0x18] sm:$0xff] %v738_v19  ;;  %v1075_v22 = vmul.f32 0.6931472, %v1646_v20 }
 0x7d0   :  { %v1076_v24 = vsub.f32 %v1069_v6, %v1075_v22 }
 0x7d2   :  { %1078 = vst [vmem:[#allocation9 + $0x28] sm:$0xff] %v1076_v24 }
 0x7d3   :  { %1726 = shalt.err (!%p1723_p0)
}
 0x7d4   :  { %s1727_s25 = scalar_lea.hbm %s2117_s5, 128 }
 0x7d5   :  { %p1728_p1 = scmp.ne.s32.totalorder %s2117_s5, %s1727_s25  ;;  %p1731_p2 = scmp.lt.u32.totalorder %s1727_s25, %s2117_s5 }
 0x7d7   :  { %p1733_p3 = pnand %p1731_p2, %p1728_p1 }
 0x7d9   :  { %1736 = shalt.err (!%p1733_p3)
}
 0x7da   :  { %1444 = dma.vmem_to_hbm [thread:$0]  %s1442_s20, 128, %s2117_s5, [#allocation11]  }
 0x7db   :  { %s1776_s6 = smov [#allocation9]  }
 0x7dc   :  { %s1428_s7 = sshll.u32 %s1776_s6, 4  ;;  %s1429_s7 = int_to_ptr.vmem [resolvable:$true] %s1428_s7 }
 0x7dd   :  { %s1737_s8 = scalar_lea.vmem %s1429_s7, 1024  ;;  %p1742_p5 = scmp.lt.s32.totalorder %s1429_s7, %s1429_s7 }
 0x7de   :  { %p1738_p4 = scmp.ne.s32.totalorder %s1429_s7, %s1737_s8  ;;  %p1743_p6 = scmp.lt.s32.totalorder %s1737_s8, %s1737_s8 }
 0x7e0   :  { %p1744_p7 = por %p1743_p6, %p1742_p5 }
 0x7e2   :  { %p1745_p8 = pnand %p1744_p7, %p1738_p4 }
 0x853   :  { %v1411_v25 = vpop.xlane.xlu1 %1410 }
 0x854   :  { %1647 = vlog2.f32 %v1411_v25 }
 0x85e   :  { %v1648_v26 = vpop.eup %1647 }
 0x85f   :  { %v1413_v27 = vmul.f32 0.6931472, %v1648_v26 }
 0x861   :  { %v1414_v28 = vsub.f32 %v1407_v56, %v1413_v27 }
 0x863   :  { %1416 = vst [vmem:[#allocation9 + $0x38] sm:$0xff] %v1414_v28 }
 0x864   :  { %1748 = shalt.err (!%p1745_p8)
}
 0x865   :  { %s1749_s5 = scalar_lea.hbm %s2116_s4, 1024 }
 0x866   :  { %p1750_p9 = scmp.ne.s32.totalorder %s2116_s4, %s1749_s5  ;;  %p1753_p10 = scmp.lt.u32.totalorder %s1749_s5, %s2116_s4 }
 0x868   :  { %p1755_p11 = pnand %p1753_p10, %p1750_p9 }
 0x86a   :  { %1758 = shalt.err (!%p1755_p11)
}
 0x86b   :  { %1434 = dma.vmem_to_hbm [thread:$0]  %s1429_s7, 1024, %s2116_s4, [#allocation5], %s1772_s0, %s1772_s0, %s1773_s21  }
 0x86c   :  { %1763 = dma.done.wait [#allocation5], 1024  }
 0x86d   :  { %1764 = vsyncadd [#allocation5], 4294966272 }
 0x86e   :  { %1765 = dma.done.wait [#allocation11], 128  }
 0x86f   :  { %1766 = vsyncadd [#allocation11], 4294967168 }
 0x870   :  { %1451 = vsyncpa [#allocation4], 1 }
 0x871   :  { %1452 = vsyncpa [#allocation7], 1 }
 0x872   :  { %1453 = vsyncpa [#allocation5], 1 }
 0x873   :  { %1454 = vsyncpa [#allocation11], 1 }

</bundles_post_ra>
